<compile_context>
chip_gen: v7x
topology: tpu7x:2x2x1
jax: 0.10.0
libtpu: 0.0.40
codegen_flags: <defaults>
</compile_context>

<pallas_src>
import math
import functools

import numpy as np
import jax
import jax.numpy as jnp
from jax.experimental import pallas as pl
from jax.experimental.pallas import tpu as pltpu


def _round_up(x, m):
    return ((x + m - 1) // m) * m


# -----------------------------------------------------------------------------
# Fused kernel: folded ChebConv residual stack + MLP head, one batch tile per step.
# -----------------------------------------------------------------------------
def _gcnn_kernel(z0_ref, w0_ref, wr_ref,
                 bc0_ref, bc1_ref, bc2_ref, bc3_ref, bc4_ref, bc5_ref,
                 w1_ref, b1_ref, w2_ref, b2_ref, w3_ref, b3_ref, o_ref):
    f32 = jnp.float32
    cdt = w0_ref.dtype                       # compute dtype (bf16 or f32)

    def mm(a, w):                            # f32-accumulating matmul on the MXU
        return jnp.dot(a.astype(cdt), w, preferred_element_type=f32)

    # ---- conv1_1 (folded): (TB, N) @ (N, N*F) ----
    h = jax.nn.relu(mm(z0_ref[...], w0_ref[...]) + bc0_ref[...])     # (TB, NF) f32

    # ---- conv1_2 .. conv3_1 (folded): one (TB, NF) @ (NF, NF) matmul each ----
    def conv(z, j, b_ref):
        return mm(z, wr_ref[j]) + b_ref[...]

    temp = h
    h = jax.nn.relu(conv(h, 0, bc1_ref))      # conv1_2 + relu
    h = temp + conv(h, 1, bc2_ref)            # conv1_3 + residual
    temp = h
    h = jax.nn.relu(conv(h, 2, bc3_ref))      # conv2_1 + relu
    h = temp + conv(h, 3, bc4_ref)            # conv2_2 + residual
    h = jax.nn.relu(conv(h, 4, bc5_ref))      # conv3_1 + relu

    # h is already in torch.reshape(x, (batch, -1)) layout -> MLP head directly.
    y = jax.nn.relu(mm(h, w1_ref[...]) + b1_ref[...])
    y = jax.nn.relu(mm(y, w2_ref[...]) + b2_ref[...])
    y = jax.nn.relu(mm(y, w3_ref[...]) + b3_ref[...])                # lane-dense slab
    o_ref[...] = y.astype(o_ref.dtype)


def gcnn_forward(x, lifted, *, out_channel, tb=256):
    """x: (B, N, 1) node features; lifted: one-time folded/lifted parameters."""
    B = x.shape[0]
    cdt = lifted["w0_eff"].dtype
    N, NF = lifted["w0_eff"].shape
    H = lifted["w_lin1"].shape[1]
    out_pad = lifted["w_lin3"].shape[1]

    # Lane-pack the scalar node feature and pad the batch to a sublane/tile multiple.
    z0 = x[..., 0].astype(cdt)                                   # (B, N)
    TB = min(tb, _round_up(B, 8))
    B_pad = _round_up(B, TB)
    if B_pad != B:
        z0 = jnp.pad(z0, ((0, B_pad - B), (0, 0)))
    grid = (B_pad // TB,)

    w_args = (lifted["w0_eff"], lifted["wr_eff"],
              lifted["bc0"], lifted["bc1"], lifted["bc2"],
              lifted["bc3"], lifted["bc4"], lifted["bc5"],
              lifted["w_lin1"], lifted["b_lin1"],
              lifted["w_lin2"], lifted["b_lin2"],
              lifted["w_lin3"], lifted["b_lin3"])

    def _resident(a):                      # full-array block, constant index_map
        nd = a.ndim
        return pl.BlockSpec(a.shape, lambda i, nd=nd: (0,) * nd)

    mm_f = lambda m, k, n: 2 * m * k * n
    flops = grid[0] * (mm_f(TB, N, NF) + 5 * mm_f(TB, NF, NF)
                       + mm_f(TB, NF, H) + mm_f(TB, H, H) + mm_f(TB, H, out_pad))
    weight_bytes = sum(int(a.size) * a.dtype.itemsize for a in w_args)
    bytes_accessed = int(weight_bytes + z0.size * z0.dtype.itemsize
                         + B_pad * out_pad * 4)

    # VMEM budget: resident weights (x2 headroom) + a handful of (TB, NF) f32 live
    # activations; clamped to fit v7x's 64 MiB while never starving the demo sizes.
    act_bytes = 4 * TB * (N + 8 * NF + 2 * H + 2 * out_pad)
    vmem_limit = int(min(64 << 20, max(32 << 20, 2 * weight_bytes + 4 * act_bytes)))

    out = pl.pallas_call(
        _gcnn_kernel,
        out_shape=jax.ShapeDtypeStruct((B_pad, out_pad), jnp.float32),
        grid_spec=pltpu.PrefetchScalarGridSpec(
            num_scalar_prefetch=0,
            grid=grid,
            in_specs=[pl.BlockSpec((TB, N), lambda i: (i, 0))]
                     + [_resident(a) for a in w_args],
            out_specs=pl.BlockSpec((TB, out_pad), lambda i: (i, 0)),
        ),
        compiler_params=pltpu.CompilerParams(
            dimension_semantics=("parallel",),
            vmem_limit_bytes=vmem_limit),
        cost_estimate=pl.CostEstimate(flops=int(flops), transcendentals=0,
                                      bytes_accessed=bytes_accessed),
    )(z0, *w_args)
    return out[:B, :out_channel]


# -----------------------------------------------------------------------------
# Parameters (PyTorch layout) and one-time host-side Chebyshev fold / lifting.
# -----------------------------------------------------------------------------
def init_params(key, *, in_channel, features, out_channel, K, hidden):
    ks = jax.random.split(key, 12)

    def dense(k, fan_in, shape):
        return (jax.random.normal(k, shape, jnp.float32)
                * (1.0 / math.sqrt(max(fan_in, 1))))

    return {
        # conv1_1 : ChebConv(1, features, K) -> K weight mats of (1, features)
        "w_conv1_1": dense(ks[0], 1, (K, 1, features)),
        # conv1_2, conv1_3, conv2_1, conv2_2, conv3_1 : ChebConv(features, features, K)
        "w_conv_rest": dense(ks[1], features, (5, K, features, features)),
        # one bias row per conv (6 convs)
        "b_conv": dense(ks[2], features, (6, features)),
        # linear layers stored as (in, out)
        "w_lin1": dense(ks[3], features * in_channel,
                        (features * in_channel, hidden)),
        "b_lin1": dense(ks[4], features * in_channel, (1, hidden)),
        "w_lin2": dense(ks[5], hidden, (hidden, hidden)),
        "b_lin2": dense(ks[6], hidden, (1, hidden)),
        "w_lin3": dense(ks[7], hidden, (hidden, out_channel)),
        "b_lin3": dense(ks[8], hidden, (1, out_channel)),
    }


def lift_params(params, Lhat, *, N, K, features, compute_dtype=jnp.bfloat16):
    """One-time fold of the Chebyshev recurrence into per-layer effective weights.

    Done on the host in numpy float64 (exact w.r.t. f32), then cast to compute_dtype.
    """
    F = features
    f64 = np.float64
    Lt = np.asarray(Lhat, f64).T                       # (N, N)   = kron(L^T, I_1)
    eyeN = np.eye(N, dtype=f64)
    M = np.kron(Lt, np.eye(F, dtype=f64))              # (NF, NF) = kron(L^T, I_F)

    def cheb_polys(mat):
        ps = [np.eye(mat.shape[0], dtype=f64)]
        if K >= 2:
            ps.append(mat)
            for _ in range(2, K):
                ps.append(2.0 * (ps[-1] @ mat) - ps[-2])
        return ps

    P1 = cheb_polys(Lt)     # conv1_1 (input feature dim = 1)
    PF = cheb_polys(M)      # F -> F convs

    w0 = np.asarray(params["w_conv1_1"], f64)          # (K, 1, F)
    wc = np.asarray(params["w_conv_rest"], f64)        # (5, K, F, F)

    # conv1_1: W0_eff = sum_k P_k(Lhat^T) @ kron(I_N, w0_k)  -> (N, N*F)
    w0_eff = sum(P1[k] @ np.kron(eyeN, w0[k]) for k in range(K))
    # conv1_2..conv3_1: W_eff_j = sum_k P_k(M) @ kron(I_N, wc[j,k]) -> (NF, NF)
    wr_eff = np.stack([sum(PF[k] @ np.kron(eyeN, wc[j, k]) for k in range(K))
                       for j in range(wc.shape[0])], axis=0)

    bc = np.tile(np.asarray(params["b_conv"], f64), (1, N))   # (6, N*F) per-slot bias

    hidden = params["w_lin2"].shape[1]
    out_channel = params["w_lin3"].shape[1]
    out_pad = _round_up(out_channel, 128)               # lane-dense output slab
    w_lin3 = np.zeros((hidden, out_pad), f64)
    w_lin3[:, :out_channel] = np.asarray(params["w_lin3"], f64)
    b_lin3 = np.zeros((1, out_pad), f64)
    b_lin3[:, :out_channel] = np.asarray(params["b_lin3"], f64)

    cdt, f32 = compute_dtype, jnp.float32
    lifted = {
        "w0_eff": jnp.asarray(w0_eff, cdt),
        "wr_eff": jnp.asarray(wr_eff, cdt),
        "w_lin1": jnp.asarray(params["w_lin1"], cdt),
        "b_lin1": jnp.asarray(params["b_lin1"], f32),
        "w_lin2": jnp.asarray(params["w_lin2"], cdt),
        "b_lin2": jnp.asarray(params["b_lin2"], f32),
        "w_lin3": jnp.asarray(w_lin3, cdt),
        "b_lin3": jnp.asarray(b_lin3, f32),
    }
    for j in range(6):
        lifted[f"bc{j}"] = jnp.asarray(bc[j:j + 1], f32)
    return lifted


def build_scaled_laplacian(adj):
    # ChebConv 'sym' normalization with default lambda_max=2.0:
    #   Lhat = (2/lambda_max) * (I - D^{-1/2} A D^{-1/2}) - I = -D^{-1/2} A D^{-1/2}
    deg = jnp.sum(adj, axis=-1)
    d_inv_sqrt = jnp.where(deg > 0, 1.0 / jnp.sqrt(deg), 0.0)
    return -adj * d_inv_sqrt[:, None] * d_inv_sqrt[None, :]


# -----------------------------------------------------------------------------
# Pure-JAX reference (mirrors the PyTorch forward) for correctness checking.
# -----------------------------------------------------------------------------
def gcnn_reference(x, Lhat, params, *, K):
    B = x.shape[0]
    w0, wc, bc = params["w_conv1_1"], params["w_conv_rest"], params["b_conv"]

    def cheb(z, w, b):
        out = jnp.einsum('bnf,fg->bng', z, w[0])
        tx0 = z
        if K >= 2:
            tx1 = jnp.einsum('nm,bmf->bnf', Lhat, z)
            out = out + jnp.einsum('bnf,fg->bng', tx1, w[1])
            for k in range(2, K):
                tx2 = 2.0 * jnp.einsum('nm,bmf->bnf', Lhat, tx1) - tx0
                out = out + jnp.einsum('bnf,fg->bng', tx2, w[k])
                tx0, tx1 = tx1, tx2
        return out + b

    h = jax.nn.relu(cheb(x, w0, bc[0]))
    temp = h
    h = jax.nn.relu(cheb(h, wc[0], bc[1]))
    h = cheb(h, wc[1], bc[2]); h = temp + h
    temp = h
    h = jax.nn.relu(cheb(h, wc[2], bc[3]))
    h = cheb(h, wc[3], bc[4]); h = temp + h
    h = jax.nn.relu(cheb(h, wc[4], bc[5]))
    h2 = h.reshape(B, -1)
    y = jax.nn.relu(h2 @ params["w_lin1"] + params["b_lin1"])
    y = jax.nn.relu(y @ params["w_lin2"] + params["b_lin2"])
    y = jax.nn.relu(y @ params["w_lin3"] + params["b_lin3"])
    return y


if __name__ == "__main__":
    # Module hyper-parameters (small, consistent with the forward pass).
    in_channel = 16      # nodes per graph (lin1 input = features * in_channel)
    features = 8
    out_channel = 4
    K = 3
    hidden = 32
    B = 2                # batch_size = batch.max()+1

    key = jax.random.PRNGKey(0)
    k_x, k_p = jax.random.split(key)

    # Node features: 1 scalar feature per node (ChebConv(1, features, K)).
    x = jax.random.normal(k_x, (B, in_channel, 1), jnp.float32)

    # Ring graph on in_channel nodes (same topology shared by every graph in the batch).
    N = in_channel
    idx = jnp.arange(N)
    adj = jnp.zeros((N, N), jnp.float32)
    adj = adj.at[idx, (idx + 1) % N].set(1.0)
    adj = adj.at[idx, (idx - 1) % N].set(1.0)
    Lhat = build_scaled_laplacian(adj)       # single (N, N) Lhat shared by the batch

    params = init_params(k_p, in_channel=in_channel, features=features,
                         out_channel=out_channel, K=K, hidden=hidden)
    ref = gcnn_reference(x, Lhat, params, K=K)

    fwd = jax.jit(functools.partial(gcnn_forward, out_channel=out_channel, tb=128))

    # --- f32 path: proves the host-side Chebyshev fold is numerically exact ---
    lifted_f32 = lift_params(params, Lhat, N=N, K=K, features=features,
                             compute_dtype=jnp.float32)
    out_f32 = jax.block_until_ready(fwd(x, lifted_f32))
    assert out_f32.shape == (B, out_channel)
    assert bool(jnp.all(jnp.isfinite(out_f32)))
    err_f32 = float(jnp.max(jnp.abs(out_f32 - ref)))
    assert bool(jnp.allclose(out_f32, ref, atol=1e-4, rtol=1e-4)), f"f32 max_err={err_f32}"

    # --- bf16 weights path (production path per perf review): looser tolerance ---
    lifted_bf16 = lift_params(params, Lhat, N=N, K=K, features=features,
                              compute_dtype=jnp.bfloat16)
    out_bf16 = jax.block_until_ready(fwd(x, lifted_bf16))
    assert out_bf16.shape == (B, out_channel)
    assert bool(jnp.all(jnp.isfinite(out_bf16)))
    err_bf16 = float(jnp.max(jnp.abs(out_bf16 - ref)))
    assert bool(jnp.allclose(out_bf16, ref, atol=1e-1, rtol=5e-2)), f"bf16 max_err={err_bf16}"

    print("KERNEL_OK")
</pallas_src>

<mosaic_0001>
module attributes {stable_mosaic.version = 11 : i64} {
  func.func @_gcnn_kernel(%arg0: i32, %arg1: memref<8x16xf32, #tpu.memory_space<vmem>>, %arg2: memref<16x128xf32, #tpu.memory_space<vmem>>, %arg3: memref<5x128x128xf32, #tpu.memory_space<vmem>>, %arg4: memref<1x128xf32, #tpu.memory_space<vmem>>, %arg5: memref<1x128xf32, #tpu.memory_space<vmem>>, %arg6: memref<1x128xf32, #tpu.memory_space<vmem>>, %arg7: memref<1x128xf32, #tpu.memory_space<vmem>>, %arg8: memref<1x128xf32, #tpu.memory_space<vmem>>, %arg9: memref<1x128xf32, #tpu.memory_space<vmem>>, %arg10: memref<128x32xf32, #tpu.memory_space<vmem>>, %arg11: memref<1x32xf32, #tpu.memory_space<vmem>>, %arg12: memref<32x32xf32, #tpu.memory_space<vmem>>, %arg13: memref<1x32xf32, #tpu.memory_space<vmem>>, %arg14: memref<32x128xf32, #tpu.memory_space<vmem>>, %arg15: memref<1x128xf32, #tpu.memory_space<vmem>>, %arg16: memref<8x128xf32, #tpu.memory_space<vmem>>) attributes {dimension_semantics = [#tpu.dimension_semantics<parallel>], iteration_bounds = array<i64: 1>, scalar_prefetch = 0 : i64, scratch_operands = 0 : i64, tpu.core_type = #tpu.core_type<tc>, window_params = [{transform_indices = @transform_0, window_bounds = array<i64: 8, 16>}, {pipeline_mode = #tpu.pipeline_mode<synchronous>, transform_indices = @transform_1, window_bounds = array<i64: 16, 128>}, {pipeline_mode = #tpu.pipeline_mode<synchronous>, transform_indices = @transform_2, window_bounds = array<i64: 5, 128, 128>}, {pipeline_mode = #tpu.pipeline_mode<synchronous>, transform_indices = @transform_3, window_bounds = array<i64: 1, 128>}, {pipeline_mode = #tpu.pipeline_mode<synchronous>, transform_indices = @transform_4, window_bounds = array<i64: 1, 128>}, {pipeline_mode = #tpu.pipeline_mode<synchronous>, transform_indices = @transform_5, window_bounds = array<i64: 1, 128>}, {pipeline_mode = #tpu.pipeline_mode<synchronous>, transform_indices = @transform_6, window_bounds = array<i64: 1, 128>}, {pipeline_mode = #tpu.pipeline_mode<synchronous>, transform_indices = @transform_7, window_bounds = array<i64: 1, 128>}, {pipeline_mode = #tpu.pipeline_mode<synchronous>, transform_indices = @transform_8, window_bounds = array<i64: 1, 128>}, {pipeline_mode = #tpu.pipeline_mode<synchronous>, transform_indices = @transform_9, window_bounds = array<i64: 128, 32>}, {pipeline_mode = #tpu.pipeline_mode<synchronous>, transform_indices = @transform_10, window_bounds = array<i64: 1, 32>}, {pipeline_mode = #tpu.pipeline_mode<synchronous>, transform_indices = @transform_11, window_bounds = array<i64: 32, 32>}, {pipeline_mode = #tpu.pipeline_mode<synchronous>, transform_indices = @transform_12, window_bounds = array<i64: 1, 32>}, {pipeline_mode = #tpu.pipeline_mode<synchronous>, transform_indices = @transform_13, window_bounds = array<i64: 32, 128>}, {pipeline_mode = #tpu.pipeline_mode<synchronous>, transform_indices = @transform_14, window_bounds = array<i64: 1, 128>}, {transform_indices = @transform_15, window_bounds = array<i64: 8, 128>}]} {
    %c0 = arith.constant 0 : index
    %c0_0 = arith.constant 0 : index
    %0 = vector.load %arg1[%c0, %c0_0] : memref<8x16xf32, #tpu.memory_space<vmem>>, vector<8x16xf32>
    %c0_1 = arith.constant 0 : index
    %c0_2 = arith.constant 0 : index
    %1 = vector.load %arg2[%c0_1, %c0_2] : memref<16x128xf32, #tpu.memory_space<vmem>>, vector<16x128xf32>
    %cst = arith.constant dense<0.000000e+00> : vector<8x128xf32>
    %2 = tpu.matmul %0, %1, %cst {dimension_numbers = #tpu.dot_dimension_numbers<[1], [0], [0], [1], [0, 0, 1, 1], [], []>} : vector<8x16xf32>, vector<16x128xf32>, vector<8x128xf32> -> vector<8x128xf32>
    %c0_3 = arith.constant 0 : index
    %c0_4 = arith.constant 0 : index
    %3 = vector.load %arg4[%c0_3, %c0_4] : memref<1x128xf32, #tpu.memory_space<vmem>>, vector<1x128xf32>
    %4 = vector.broadcast %3 : vector<1x128xf32> to vector<8x128xf32>
    %5 = arith.addf %2, %4 : vector<8x128xf32>
    %cst_5 = arith.constant 0.000000e+00 : f32
    %6 = vector.broadcast %cst_5 : f32 to vector<8x128xf32>
    %7 = arith.maximumf %5, %6 : vector<8x128xf32>
    %c0_6 = arith.constant 0 : index
    %c0_7 = arith.constant 0 : index
    %c0_8 = arith.constant 0 : index
    %8 = vector.load %arg3[%c0_6, %c0_7, %c0_8] : memref<5x128x128xf32, #tpu.memory_space<vmem>>, vector<1x128x128xf32>
    %9 = vector.shape_cast %8 : vector<1x128x128xf32> to vector<128x128xf32>
    %cst_9 = arith.constant dense<0.000000e+00> : vector<8x128xf32>
    %10 = tpu.matmul %7, %9, %cst_9 {dimension_numbers = #tpu.dot_dimension_numbers<[1], [0], [0], [1], [0, 0, 1, 1], [], []>} : vector<8x128xf32>, vector<128x128xf32>, vector<8x128xf32> -> vector<8x128xf32>
    %c0_10 = arith.constant 0 : index
    %c0_11 = arith.constant 0 : index
    %11 = vector.load %arg5[%c0_10, %c0_11] : memref<1x128xf32, #tpu.memory_space<vmem>>, vector<1x128xf32>
    %12 = vector.broadcast %11 : vector<1x128xf32> to vector<8x128xf32>
    %13 = arith.addf %10, %12 : vector<8x128xf32>
    %cst_12 = arith.constant 0.000000e+00 : f32
    %14 = vector.broadcast %cst_12 : f32 to vector<8x128xf32>
    %15 = arith.maximumf %13, %14 : vector<8x128xf32>
    %c1 = arith.constant 1 : index
    %c0_13 = arith.constant 0 : index
    %c0_14 = arith.constant 0 : index
    %16 = vector.load %arg3[%c1, %c0_13, %c0_14] : memref<5x128x128xf32, #tpu.memory_space<vmem>>, vector<1x128x128xf32>
    %17 = vector.shape_cast %16 : vector<1x128x128xf32> to vector<128x128xf32>
    %cst_15 = arith.constant dense<0.000000e+00> : vector<8x128xf32>
    %18 = tpu.matmul %15, %17, %cst_15 {dimension_numbers = #tpu.dot_dimension_numbers<[1], [0], [0], [1], [0, 0, 1, 1], [], []>} : vector<8x128xf32>, vector<128x128xf32>, vector<8x128xf32> -> vector<8x128xf32>
    %c0_16 = arith.constant 0 : index
    %c0_17 = arith.constant 0 : index
    %19 = vector.load %arg6[%c0_16, %c0_17] : memref<1x128xf32, #tpu.memory_space<vmem>>, vector<1x128xf32>
    %20 = vector.broadcast %19 : vector<1x128xf32> to vector<8x128xf32>
    %21 = arith.addf %18, %20 : vector<8x128xf32>
    %22 = arith.addf %7, %21 : vector<8x128xf32>
    %c2 = arith.constant 2 : index
    %c0_18 = arith.constant 0 : index
    %c0_19 = arith.constant 0 : index
    %23 = vector.load %arg3[%c2, %c0_18, %c0_19] : memref<5x128x128xf32, #tpu.memory_space<vmem>>, vector<1x128x128xf32>
    %24 = vector.shape_cast %23 : vector<1x128x128xf32> to vector<128x128xf32>
    %cst_20 = arith.constant dense<0.000000e+00> : vector<8x128xf32>
    %25 = tpu.matmul %22, %24, %cst_20 {dimension_numbers = #tpu.dot_dimension_numbers<[1], [0], [0], [1], [0, 0, 1, 1], [], []>} : vector<8x128xf32>, vector<128x128xf32>, vector<8x128xf32> -> vector<8x128xf32>
    %c0_21 = arith.constant 0 : index
    %c0_22 = arith.constant 0 : index
    %26 = vector.load %arg7[%c0_21, %c0_22] : memref<1x128xf32, #tpu.memory_space<vmem>>, vector<1x128xf32>
    %27 = vector.broadcast %26 : vector<1x128xf32> to vector<8x128xf32>
    %28 = arith.addf %25, %27 : vector<8x128xf32>
    %cst_23 = arith.constant 0.000000e+00 : f32
    %29 = vector.broadcast %cst_23 : f32 to vector<8x128xf32>
    %30 = arith.maximumf %28, %29 : vector<8x128xf32>
    %c3 = arith.constant 3 : index
    %c0_24 = arith.constant 0 : index
    %c0_25 = arith.constant 0 : index
    %31 = vector.load %arg3[%c3, %c0_24, %c0_25] : memref<5x128x128xf32, #tpu.memory_space<vmem>>, vector<1x128x128xf32>
    %32 = vector.shape_cast %31 : vector<1x128x128xf32> to vector<128x128xf32>
    %cst_26 = arith.constant dense<0.000000e+00> : vector<8x128xf32>
    %33 = tpu.matmul %30, %32, %cst_26 {dimension_numbers = #tpu.dot_dimension_numbers<[1], [0], [0], [1], [0, 0, 1, 1], [], []>} : vector<8x128xf32>, vector<128x128xf32>, vector<8x128xf32> -> vector<8x128xf32>
    %c0_27 = arith.constant 0 : index
    %c0_28 = arith.constant 0 : index
    %34 = vector.load %arg8[%c0_27, %c0_28] : memref<1x128xf32, #tpu.memory_space<vmem>>, vector<1x128xf32>
    %35 = vector.broadcast %34 : vector<1x128xf32> to vector<8x128xf32>
    %36 = arith.addf %33, %35 : vector<8x128xf32>
    %37 = arith.addf %22, %36 : vector<8x128xf32>
    %c4 = arith.constant 4 : index
    %c0_29 = arith.constant 0 : index
    %c0_30 = arith.constant 0 : index
    %38 = vector.load %arg3[%c4, %c0_29, %c0_30] : memref<5x128x128xf32, #tpu.memory_space<vmem>>, vector<1x128x128xf32>
    %39 = vector.shape_cast %38 : vector<1x128x128xf32> to vector<128x128xf32>
    %cst_31 = arith.constant dense<0.000000e+00> : vector<8x128xf32>
    %40 = tpu.matmul %37, %39, %cst_31 {dimension_numbers = #tpu.dot_dimension_numbers<[1], [0], [0], [1], [0, 0, 1, 1], [], []>} : vector<8x128xf32>, vector<128x128xf32>, vector<8x128xf32> -> vector<8x128xf32>
    %c0_32 = arith.constant 0 : index
    %c0_33 = arith.constant 0 : index
    %41 = vector.load %arg9[%c0_32, %c0_33] : memref<1x128xf32, #tpu.memory_space<vmem>>, vector<1x128xf32>
    %42 = vector.broadcast %41 : vector<1x128xf32> to vector<8x128xf32>
    %43 = arith.addf %40, %42 : vector<8x128xf32>
    %cst_34 = arith.constant 0.000000e+00 : f32
    %44 = vector.broadcast %cst_34 : f32 to vector<8x128xf32>
    %45 = arith.maximumf %43, %44 : vector<8x128xf32>
    %c0_35 = arith.constant 0 : index
    %c0_36 = arith.constant 0 : index
    %46 = vector.load %arg10[%c0_35, %c0_36] : memref<128x32xf32, #tpu.memory_space<vmem>>, vector<128x32xf32>
    %cst_37 = arith.constant dense<0.000000e+00> : vector<8x32xf32>
    %47 = tpu.matmul %45, %46, %cst_37 {dimension_numbers = #tpu.dot_dimension_numbers<[1], [0], [0], [1], [0, 0, 1, 1], [], []>} : vector<8x128xf32>, vector<128x32xf32>, vector<8x32xf32> -> vector<8x32xf32>
    %c0_38 = arith.constant 0 : index
    %c0_39 = arith.constant 0 : index
    %48 = vector.load %arg11[%c0_38, %c0_39] : memref<1x32xf32, #tpu.memory_space<vmem>>, vector<1x32xf32>
    %49 = vector.broadcast %48 : vector<1x32xf32> to vector<8x32xf32>
    %50 = arith.addf %47, %49 : vector<8x32xf32>
    %cst_40 = arith.constant 0.000000e+00 : f32
    %51 = vector.broadcast %cst_40 : f32 to vector<8x32xf32>
    %52 = arith.maximumf %50, %51 : vector<8x32xf32>
    %c0_41 = arith.constant 0 : index
    %c0_42 = arith.constant 0 : index
    %53 = vector.load %arg12[%c0_41, %c0_42] : memref<32x32xf32, #tpu.memory_space<vmem>>, vector<32x32xf32>
    %cst_43 = arith.constant dense<0.000000e+00> : vector<8x32xf32>
    %54 = tpu.matmul %52, %53, %cst_43 {dimension_numbers = #tpu.dot_dimension_numbers<[1], [0], [0], [1], [0, 0, 1, 1], [], []>} : vector<8x32xf32>, vector<32x32xf32>, vector<8x32xf32> -> vector<8x32xf32>
    %c0_44 = arith.constant 0 : index
    %c0_45 = arith.constant 0 : index
    %55 = vector.load %arg13[%c0_44, %c0_45] : memref<1x32xf32, #tpu.memory_space<vmem>>, vector<1x32xf32>
    %56 = vector.broadcast %55 : vector<1x32xf32> to vector<8x32xf32>
    %57 = arith.addf %54, %56 : vector<8x32xf32>
    %cst_46 = arith.constant 0.000000e+00 : f32
    %58 = vector.broadcast %cst_46 : f32 to vector<8x32xf32>
    %59 = arith.maximumf %57, %58 : vector<8x32xf32>
    %c0_47 = arith.constant 0 : index
    %c0_48 = arith.constant 0 : index
    %60 = vector.load %arg14[%c0_47, %c0_48] : memref<32x128xf32, #tpu.memory_space<vmem>>, vector<32x128xf32>
    %cst_49 = arith.constant dense<0.000000e+00> : vector<8x128xf32>
    %61 = tpu.matmul %59, %60, %cst_49 {dimension_numbers = #tpu.dot_dimension_numbers<[1], [0], [0], [1], [0, 0, 1, 1], [], []>} : vector<8x32xf32>, vector<32x128xf32>, vector<8x128xf32> -> vector<8x128xf32>
    %c0_50 = arith.constant 0 : index
    %c0_51 = arith.constant 0 : index
    %62 = vector.load %arg15[%c0_50, %c0_51] : memref<1x128xf32, #tpu.memory_space<vmem>>, vector<1x128xf32>
    %63 = vector.broadcast %62 : vector<1x128xf32> to vector<8x128xf32>
    %64 = arith.addf %61, %63 : vector<8x128xf32>
    %cst_52 = arith.constant 0.000000e+00 : f32
    %65 = vector.broadcast %cst_52 : f32 to vector<8x128xf32>
    %66 = arith.maximumf %64, %65 : vector<8x128xf32>
    %c0_53 = arith.constant 0 : index
    %c0_54 = arith.constant 0 : index
    %67 = vector.load %arg16[%c0_53, %c0_54] : memref<8x128xf32, #tpu.memory_space<vmem>>, vector<8x128xf32>
    tpu.vector_store %arg16[%c0_53, %c0_54], %66 {strides = array<i32>} : memref<8x128xf32, #tpu.memory_space<vmem>>, vector<8x128xf32>,
    return
  }
  func.func @transform_0(%arg0: i32) -> (i32, i32) {
    %c0_i32 = arith.constant 0 : i32
    %c0_i32_0 = arith.constant 0 : i32
    return %arg0, %c0_i32 : i32, i32
  }
  func.func @transform_1(%arg0: i32) -> (i32, i32) {
    %c0_i32 = arith.constant 0 : i32
    %c0_i32_0 = arith.constant 0 : i32
    %c0_i32_1 = arith.constant 0 : i32
    return %c0_i32, %c0_i32_0 : i32, i32
  }
  func.func @transform_2(%arg0: i32) -> (i32, i32, i32) {
    %c0_i32 = arith.constant 0 : i32
    %c0_i32_0 = arith.constant 0 : i32
    %c0_i32_1 = arith.constant 0 : i32
    %c0_i32_2 = arith.constant 0 : i32
    return %c0_i32, %c0_i32_0, %c0_i32_1 : i32, i32, i32
  }
  func.func @transform_3(%arg0: i32) -> (i32, i32) {
    %c0_i32 = arith.constant 0 : i32
    %c0_i32_0 = arith.constant 0 : i32
    %c0_i32_1 = arith.constant 0 : i32
    return %c0_i32, %c0_i32_0 : i32, i32
  }
  func.func @transform_4(%arg0: i32) -> (i32, i32) {
    %c0_i32 = arith.constant 0 : i32
    %c0_i32_0 = arith.constant 0 : i32
    %c0_i32_1 = arith.constant 0 : i32
    return %c0_i32, %c0_i32_0 : i32, i32
  }
  func.func @transform_5(%arg0: i32) -> (i32, i32) {
    %c0_i32 = arith.constant 0 : i32
    %c0_i32_0 = arith.constant 0 : i32
    %c0_i32_1 = arith.constant 0 : i32
    return %c0_i32, %c0_i32_0 : i32, i32
  }
  func.func @transform_6(%arg0: i32) -> (i32, i32) {
    %c0_i32 = arith.constant 0 : i32
    %c0_i32_0 = arith.constant 0 : i32
    %c0_i32_1 = arith.constant 0 : i32
    return %c0_i32, %c0_i32_0 : i32, i32
  }
  func.func @transform_7(%arg0: i32) -> (i32, i32) {
    %c0_i32 = arith.constant 0 : i32
    %c0_i32_0 = arith.constant 0 : i32
    %c0_i32_1 = arith.constant 0 : i32
    return %c0_i32, %c0_i32_0 : i32, i32
  }
  func.func @transform_8(%arg0: i32) -> (i32, i32) {
    %c0_i32 = arith.constant 0 : i32
    %c0_i32_0 = arith.constant 0 : i32
    %c0_i32_1 = arith.constant 0 : i32
    return %c0_i32, %c0_i32_0 : i32, i32
  }
  func.func @transform_9(%arg0: i32) -> (i32, i32) {
    %c0_i32 = arith.constant 0 : i32
    %c0_i32_0 = arith.constant 0 : i32
    %c0_i32_1 = arith.constant 0 : i32
    return %c0_i32, %c0_i32_0 : i32, i32
  }
  func.func @transform_10(%arg0: i32) -> (i32, i32) {
    %c0_i32 = arith.constant 0 : i32
    %c0_i32_0 = arith.constant 0 : i32
    %c0_i32_1 = arith.constant 0 : i32
    return %c0_i32, %c0_i32_0 : i32, i32
  }
  func.func @transform_11(%arg0: i32) -> (i32, i32) {
    %c0_i32 = arith.constant 0 : i32
    %c0_i32_0 = arith.constant 0 : i32
    %c0_i32_1 = arith.constant 0 : i32
    return %c0_i32, %c0_i32_0 : i32, i32
  }
  func.func @transform_12(%arg0: i32) -> (i32, i32) {
    %c0_i32 = arith.constant 0 : i32
    %c0_i32_0 = arith.constant 0 : i32
    %c0_i32_1 = arith.constant 0 : i32
    return %c0_i32, %c0_i32_0 : i32, i32
  }
  func.func @transform_13(%arg0: i32) -> (i32, i32) {
    %c0_i32 = arith.constant 0 : i32
    %c0_i32_0 = arith.constant 0 : i32
    %c0_i32_1 = arith.constant 0 : i32
    return %c0_i32, %c0_i32_0 : i32, i32
  }
  func.func @transform_14(%arg0: i32) -> (i32, i32) {
    %c0_i32 = arith.constant 0 : i32
    %c0_i32_0 = arith.constant 0 : i32
    %c0_i32_1 = arith.constant 0 : i32
    return %c0_i32, %c0_i32_0 : i32, i32
  }
  func.func @transform_15(%arg0: i32) -> (i32, i32) {
    %c0_i32 = arith.constant 0 : i32
    %c0_i32_0 = arith.constant 0 : i32
    return %arg0, %c0_i32 : i32, i32
  }
}

</mosaic_0001>

<bundles_post_ra>
// kernel: gcnn_forward.1
= control target key start
LH: loop header
LB: loop body
LE: loop exit
PB: predicated region body
PF: predicated region fallthrough
CT: control target
= control target key end

     0   :  { %20 = vsyncpa [#allocation3], 0  ;;  %s1449_s18 = smov [#allocation2]   ;;  %s1740_s0 = inlined_call_operand.vmem [shape: f32[8,16], index: 0, kind: input, shape index: {}]   ;;  %s1741_s1 = inlined_call_operand.vmem [shape: f32[16,128], index: 1, kind: input, shape index: {}]   ;;  %s1742_s2 = inlined_call_operand.hbm [shape: f32[5,128,128], index: 2, kind: input, shape index: {}]   ;;  %s1743_s3 = inlined_call_operand.vmem [shape: f32[1,128], index: 3, kind: input, shape index: {}]   ;;  %s1744_s4 = inlined_call_operand.vmem [shape: f32[1,128], index: 4, kind: input, shape index: {}]   ;;  %s1745_s5 = inlined_call_operand.vmem [shape: f32[1,128], index: 5, kind: input, shape index: {}]   ;;  %s1746_s6 = inlined_call_operand.vmem [shape: f32[1,128], index: 6, kind: input, shape index: {}]   ;;  %s1747_s7 = inlined_call_operand.vmem [shape: f32[1,128], index: 7, kind: input, shape index: {}]   ;;  %s1748_s8 = inlined_call_operand.vmem [shape: f32[1,128], index: 8, kind: input, shape index: {}]   ;;  %s1749_s9 = inlined_call_operand.vmem [shape: f32[128,32], index: 9, kind: input, shape index: {}]   ;;  %s1750_s10 = inlined_call_operand.vmem [shape: f32[1,32], index: 10, kind: input, shape index: {}]   ;;  %s1751_s11 = inlined_call_operand.vmem [shape: f32[32,32], index: 11, kind: input, shape index: {}]   ;;  %s1752_s12 = inlined_call_operand.vmem [shape: f32[1,32], index: 12, kind: input, shape index: {}]   ;;  %s1753_s13 = inlined_call_operand.vmem [shape: f32[32,128], index: 13, kind: input, shape index: {}]   ;;  %s1754_s14 = inlined_call_operand.vmem [shape: f32[1,128], index: 14, kind: input, shape index: {}]   ;;  %s1755_s15 = inlined_call_operand.vmem [shape: f32[8,128], index: 15, kind: output, shape index: {}]  }
   0x1   :  { %s30_s19 = sshll.u32 %s1449_s18, 4  ;;  %s1425_s22 = scalar_lea.hbm %s1742_s2, 10240  ;;  %s31_s19 = int_to_ptr.vmem [resolvable:$true] %s30_s19 }
   0x2   :  { %p1426_p0 = scmp.ne.s32.totalorder %s1742_s2, %s1425_s22  ;;  %p1429_p1 = scmp.lt.u32.totalorder %s1425_s22, %s1742_s2 }
   0x4   :  { %p1431_p2 = pnand %p1429_p1, %p1426_p0 }
   0x6   :  { %1434 = shalt.err (!%p1431_p2)
}
   0x7   :  { %s1435_s27 = scalar_lea.vmem %s31_s19, 10240  ;;  %p1440_p4 = scmp.lt.s32.totalorder %s31_s19, %s31_s19 }
   0x8   :  { %p1436_p3 = scmp.ne.s32.totalorder %s31_s19, %s1435_s27  ;;  %p1441_p5 = scmp.lt.s32.totalorder %s1435_s27, %s1435_s27 }
   0xa   :  { %p1442_p6 = por %p1441_p5, %p1440_p4 }
   0xc   :  { %p1443_p7 = pnand %p1442_p6, %p1436_p3 }
   0xe   :  { %1446 = shalt.err (!%p1443_p7)
}
   0xf   :  { %s1450_s28 = smov 128   ;;  %s1451_s29 = smov 8  }
  0x10   :  { %36 = dma.hbm_to_vmem [thread:$0]  %s1742_s2, 10240, %s31_s19, [#allocation3], %s1450_s28, %s1450_s28, %s1451_s29  }
  0x11   :  { %1447 = dma.done.wait [#allocation3], 10240  }
  0x12   :  { %1448 = vsyncadd [#allocation3], 4294957056  ;;  %v1452_v0 = vmov 0.0|0.0   ;;  %vm1453_vm0 = vmmov 0   ;;  %v1454_v1 = vmov 0.0   ;;  %v65_v2 = vld [vmem:[%s1741_s1] sm:$0xff] }
  0x13   :  { %1260 = vmatprep.subr.bf16.mxu0 %v1452_v0  ;;  %1025 = vmatprep.mubr.msk.f32.mxu0 %vm1453_vm0, %v1454_v1  ;;  %v66_v3 = vld [vmem:[%s1741_s1 + $0x8] sm:$0xff]  ;;  %v149_v5 = vld [vmem:[#allocation2] sm:$0xff]  ;;  %v151_v7 = vld [vmem:[#allocation2 + $0x10] sm:$0xff]  ;;  %vm74_vm1 = vcmask 130048   ;;  %vm728_vm2 = vcmask 261120  }
  0x14   :  { %1263 = vmatprep.subr.bf16.mxu1 %v1452_v0  ;;  %1060 = vmatprep.mubr.msk.f32.mxu1 %vm1453_vm0, %v1454_v1  ;;  %v1261_v4 = vpack.c.bf16 %v66_v3, %v65_v2  ;;  %v150_v6 = vld [vmem:[#allocation2 + $0x8] sm:$0xff]  ;;  %v152_v9 = vld [vmem:[#allocation2 + $0x18] sm:$0xff]  ;;  %v64_v10 = vld [vmem:[%s1740_s0] sm:$0xff] }
  0x15   :  { %v1264_v8 = vpack.c.bf16 %v150_v6, %v149_v5  ;;  %v1267_v11 = vpack.c.bf16 %v152_v9, %v151_v7  ;;  %v153_v12 = vld [vmem:[#allocation2 + $0x20] sm:$0xff]  ;;  %v154_v13 = vld [vmem:[#allocation2 + $0x28] sm:$0xff]  ;;  %v155_v15 = vld [vmem:[#allocation2 + $0x30] sm:$0xff] }
  0x16   :  { %1262 = vmatpush3.bf16.msra.mxu0 %v1261_v4  ;;  %v1270_v14 = vpack.c.bf16 %v154_v13, %v153_v12  ;;  %v156_v16 = vld [vmem:[#allocation2 + $0x38] sm:$0xff]  ;;  %v157_v18 = vld [vmem:[#allocation2 + $0x40] sm:$0xff]  ;;  %v158_v19 = vld [vmem:[#allocation2 + $0x48] sm:$0xff] }
  0x17   :  { %1265 = vmatpush3.bf16.msra.mxu1 %v1264_v8  ;;  %1287 = vmatprep.subr.bf16.mxu0 %v1452_v0  ;;  %v1273_v17 = vpack.c.bf16 %v156_v16, %v155_v15  ;;  %v1276_v20 = vpack.c.bf16 %v158_v19, %v157_v18  ;;  %v159_v21 = vld [vmem:[#allocation2 + $0x50] sm:$0xff]  ;;  %v160_v22 = vld [vmem:[#allocation2 + $0x58] sm:$0xff]  ;;  %v161_v24 = vld [vmem:[#allocation2 + $0x60] sm:$0xff] }
  0x18   :  { %1266 = vmatprep.subr.bf16.mxu1 %v1452_v0  ;;  %v1279_v23 = vpack.c.bf16 %v160_v22, %v159_v21  ;;  %v162_v25 = vld [vmem:[#allocation2 + $0x68] sm:$0xff]  ;;  %v163_v27 = vld [vmem:[#allocation2 + $0x70] sm:$0xff]  ;;  %v164_v28 = vld [vmem:[#allocation2 + $0x78] sm:$0xff] }
  0x19   :  { %1026 = vmatmul.mubr.msk.f32.vlgmr.msra.gmra.mrb[0].mxu0 %vm74_vm1, %v64_v10  ;;  %v1282_v26 = vpack.c.bf16 %v162_v25, %v161_v24  ;;  %v1285_v29 = vpack.c.bf16 %v164_v28, %v163_v27  ;;  %v244_v30 = vld [vmem:[#allocation2 + $0x80] sm:$0xff]  ;;  %v245_v31 = vld [vmem:[#allocation2 + $0x88] sm:$0xff]  ;;  %v246_v32 = vld [vmem:[#allocation2 + $0x90] sm:$0xff] }
  0x1a   :  { %1095 = vmatprep.mubr.msk.f32.mxu0 %vm1453_vm0, %v1454_v1  ;;  %v1288_v33 = vpack.c.bf16 %v245_v31, %v244_v30  ;;  %v247_v34 = vld [vmem:[#allocation2 + $0x98] sm:$0xff]  ;;  %v248_v36 = vld [vmem:[#allocation2 + $0xa0] sm:$0xff]  ;;  %v249_v37 = vld [vmem:[#allocation2 + $0xa8] sm:$0xff] }
  0x1b   :  { %1268 = vmatpush3.bf16.msra.mxu1 %v1267_v11  ;;  %v1291_v35 = vpack.c.bf16 %v247_v34, %v246_v32  ;;  %v1294_v38 = vpack.c.bf16 %v249_v37, %v248_v36  ;;  %v250_v39 = vld [vmem:[#allocation2 + $0xb0] sm:$0xff]  ;;  %v251_v40 = vld [vmem:[#allocation2 + $0xb8] sm:$0xff]  ;;  %v252_v42 = vld [vmem:[#allocation2 + $0xc0] sm:$0xff] }
  0x1c   :  { %1269 = vmatprep.subr.bf16.mxu1 %v1452_v0  ;;  %1289 = vmatpush3.bf16.msra.mxu0 %v1288_v33  ;;  %v1297_v41 = vpack.c.bf16 %v251_v40, %v250_v39  ;;  %v253_v43 = vld [vmem:[#allocation2 + $0xc8] sm:$0xff]  ;;  %v254_v45 = vld [vmem:[#allocation2 + $0xd0] sm:$0xff]  ;;  %v255_v46 = vld [vmem:[#allocation2 + $0xd8] sm:$0xff] }
  0x1d   :  { %1290 = vmatprep.subr.bf16.mxu0 %v1452_v0  ;;  %v1300_v44 = vpack.c.bf16 %v253_v43, %v252_v42  ;;  %v1303_v47 = vpack.c.bf16 %v255_v46, %v254_v45  ;;  %v256_v48 = vld [vmem:[#allocation2 + $0xe0] sm:$0xff]  ;;  %v257_v49 = vld [vmem:[#allocation2 + $0xe8] sm:$0xff]  ;;  %v258_v56 = vld [vmem:[#allocation2 + $0xf0] sm:$0xff] }
  0x1e   :  { %v1306_v50 = vpack.c.bf16 %v257_v49, %v256_v48  ;;  %v894_v51 = vld [vmem:[%s1743_s3] ss:$0 sm:$0xff]  ;;  %v259_v57 = vld [vmem:[#allocation2 + $0xf8] sm:$0xff]  ;;  %v340_v60 = vld [vmem:[#allocation2 + $0x108] sm:$0xff] }
  0x1f   :  { %1271 = vmatpush3.bf16.msra.mxu1 %v1270_v14  ;;  %v1309_v58 = vpack.c.bf16 %v259_v57, %v258_v56  ;;  %v339_v59 = vld [vmem:[#allocation2 + $0x100] sm:$0xff]  ;;  %v341_v61 = vld [vmem:[#allocation2 + $0x110] sm:$0xff]  ;;  %v342_v63 = vld [vmem:[#allocation2 + $0x118] sm:$0xff] }
  0x20   :  { %1272 = vmatprep.subr.bf16.mxu1 %v1452_v0  ;;  %1292 = vmatpush3.bf16.msra.mxu0 %v1291_v35  ;;  %v1312_v62 = vpack.c.bf16 %v340_v60, %v339_v59  ;;  %v1315_v2 = vpack.c.bf16 %v342_v63, %v341_v61  ;;  %v343_v3 = vld [vmem:[#allocation2 + $0x120] sm:$0xff]  ;;  %v344_v4 = vld [vmem:[#allocation2 + $0x128] sm:$0xff]  ;;  %v345_v6 = vld [vmem:[#allocation2 + $0x130] sm:$0xff] }
  0x21   :  { %1293 = vmatprep.subr.bf16.mxu0 %v1452_v0  ;;  %v1318_v5 = vpack.c.bf16 %v344_v4, %v343_v3  ;;  %v346_v7 = vld [vmem:[#allocation2 + $0x138] sm:$0xff]  ;;  %v347_v9 = vld [vmem:[#allocation2 + $0x140] sm:$0xff]  ;;  %v348_v10 = vld [vmem:[#allocation2 + $0x148] sm:$0xff] }
  0x22   :  { %v1321_v8 = vpack.c.bf16 %v346_v7, %v345_v6  ;;  %v1324_v11 = vpack.c.bf16 %v348_v10, %v347_v9  ;;  %v349_v12 = vld [vmem:[#allocation2 + $0x150] sm:$0xff]  ;;  %v350_v13 = vld [vmem:[#allocation2 + $0x158] sm:$0xff]  ;;  %v351_v15 = vld [vmem:[#allocation2 + $0x160] sm:$0xff] }
  0x23   :  { %1274 = vmatpush3.bf16.msra.mxu1 %v1273_v17  ;;  %v1327_v14 = vpack.c.bf16 %v350_v13, %v349_v12  ;;  %v352_v16 = vld [vmem:[#allocation2 + $0x168] sm:$0xff]  ;;  %v896_v18 = vld [vmem:[%s1744_s4] ss:$0 sm:$0xff]  ;;  %v354_v24 = vld [vmem:[#allocation2 + $0x178] sm:$0xff] }
  0x24   :  { %1275 = vmatprep.subr.bf16.mxu1 %v1452_v0  ;;  %1295 = vmatpush3.bf16.msra.mxu0 %v1294_v38  ;;  %v1330_v17 = vpack.c.bf16 %v352_v16, %v351_v15  ;;  %v435_v27 = vld [vmem:[#allocation2 + $0x188] sm:$0xff]  ;;  %v436_v28 = vld [vmem:[#allocation2 + $0x190] sm:$0xff]  ;;  %v437_v30 = vld [vmem:[#allocation2 + $0x198] sm:$0xff] }
  0x25   :  { %1296 = vmatprep.subr.bf16.mxu0 %v1452_v0  ;;  %v1339_v31 = vpack.c.bf16 %v437_v30, %v436_v28  ;;  %v438_v32 = vld [vmem:[#allocation2 + $0x1a0] sm:$0xff]  ;;  %v439_v33 = vld [vmem:[#allocation2 + $0x1a8] sm:$0xff]  ;;  %v440_v35 = vld [vmem:[#allocation2 + $0x1b0] sm:$0xff] }
  0x26   :  { %v1342_v34 = vpack.c.bf16 %v439_v33, %v438_v32  ;;  %v441_v36 = vld [vmem:[#allocation2 + $0x1b8] sm:$0xff]  ;;  %v442_v38 = vld [vmem:[#allocation2 + $0x1c0] sm:$0xff]  ;;  %v443_v39 = vld [vmem:[#allocation2 + $0x1c8] sm:$0xff] }
  0x27   :  { %1277 = vmatpush3.bf16.msra.mxu1 %v1276_v20  ;;  %v1345_v37 = vpack.c.bf16 %v441_v36, %v440_v35  ;;  %v1348_v40 = vpack.c.bf16 %v443_v39, %v442_v38  ;;  %v445_v42 = vld [vmem:[#allocation2 + $0x1d8] sm:$0xff]  ;;  %v447_v45 = vld [vmem:[#allocation2 + $0x1e8] sm:$0xff]  ;;  %v529_v57 = vld [vmem:[#allocation2 + $0x200] sm:$0xff] }
  0x28   :  { %1278 = vmatprep.subr.bf16.mxu1 %v1452_v0  ;;  %1298 = vmatpush3.bf16.msra.mxu0 %v1297_v41  ;;  %v444_v41 = vld [vmem:[#allocation2 + $0x1d0] sm:$0xff]  ;;  %v532_v61 = vld [vmem:[#allocation2 + $0x218] sm:$0xff]  ;;  %v538_v6 = vld [vmem:[#allocation2 + $0x248] sm:$0xff] }
  0x29   :  { %1299 = vmatprep.subr.bf16.mxu0 %v1452_v0  ;;  %v1351_v43 = vpack.c.bf16 %v445_v42, %v444_v41  ;;  %v531_v59 = vld [vmem:[#allocation2 + $0x210] sm:$0xff]  ;;  %v536_v3 = vld [vmem:[#allocation2 + $0x238] sm:$0xff]  ;;  %v542_v12 = vld [vmem:[#allocation2 + $0x268] sm:$0xff] }
  0x2a   :  { %v540_v9 = vld [vmem:[#allocation2 + $0x258] sm:$0xff]  ;;  %v627_v28 = vld [vmem:[%s1749_s9 + $0x20] sm:$0xff]  ;;  %v632_v35 = vld [vmem:[%s1749_s9 + $0x48] sm:$0xff] }
  0x2b   :  { %1280 = vmatpush3.bf16.msra.mxu1 %v1279_v23  ;;  %v353_v23 = vld [vmem:[#allocation2 + $0x170] sm:$0xff]  ;;  %v630_v32 = vld [vmem:[%s1749_s9 + $0x38] sm:$0xff]  ;;  %v636_v41 = vld [vmem:[%s1749_s9 + $0x68] sm:$0xff] }
  0x2c   :  { %1281 = vmatprep.subr.bf16.mxu1 %v1452_v0  ;;  %1301 = vmatpush3.bf16.msra.mxu0 %v1300_v44  ;;  %v1333_v25 = vpack.c.bf16 %v354_v24, %v353_v23  ;;  %v446_v44 = vld [vmem:[#allocation2 + $0x1e0] sm:$0xff]  ;;  %v624_v23 = vld [vmem:[%s1749_s9 + $0x8] sm:$0xff]  ;;  %v625_v24 = vld [vmem:[%s1749_s9 + $0x10] sm:$0xff] }
  0x2d   :  { %1302 = vmatprep.subr.bf16.mxu0 %v1452_v0  ;;  %v1354_v46 = vpack.c.bf16 %v447_v45, %v446_v44  ;;  %v634_v38 = vld [vmem:[%s1749_s9 + $0x58] sm:$0xff] }
  0x2f   :  { %1283 = vmatpush3.bf16.msra.mxu1 %v1282_v26  ;;  %v434_v26 = vld [vmem:[#allocation2 + $0x180] sm:$0xff] }
  0x30   :  { %1284 = vmatprep.subr.bf16.mxu1 %v1452_v0  ;;  %1304 = vmatpush3.bf16.msra.mxu0 %v1303_v47  ;;  %v897_v47 = vld [vmem:[%s1745_s5] ss:$0 sm:$0xff] }
  0x31   :  { %1305 = vmatprep.subr.bf16.mxu0 %v1452_v0 }
  0x33   :  { %1286 = vmatpush3.bf16.msra.mxu1 %v1285_v29  ;;  %v1336_v29 = vpack.c.bf16 %v435_v27, %v434_v26  ;;  %v626_v26 = vld [vmem:[%s1749_s9 + $0x18] sm:$0xff] }
  0x34   :  { %1311 = vmatprep.subr.bf16.mxu1 %v1452_v0  ;;  %1307 = vmatpush3.bf16.msra.mxu0 %v1306_v50  ;;  %v1387_v27 = vpack.c.bf16 %v626_v26, %v625_v24 }
  0x35   :  { %1308 = vmatprep.subr.bf16.mxu0 %v1452_v0 }
  0x38   :  { %1310 = vmatpush3.bf16.msra.mxu0 %v1309_v58  ;;  %v530_v58 = vld [vmem:[#allocation2 + $0x208] sm:$0xff] }
  0x39   :  { %1335 = vmatprep.subr.bf16.mxu0 %v1452_v0  ;;  %v1360_v60 = vpack.c.bf16 %v530_v58, %v529_v57 }
  0xec   :  { %v144_v52 = vpop.f32.mrb[0].mxu0 }
  0xed   :  { %v1583_v53 = vadd.f32 %v894_v51, %v144_v52  ;;  %v1027_v54 = vpop.f32.mrb[1].mxu0  ;;  %v448_v52 = vld [vmem:[#allocation2 + $0x1f0] sm:$0xff] }
  0xee   :  { %v449_v54 = vld [vmem:[#allocation2 + $0x1f8] sm:$0xff] }
  0xef   :  { %v148_v55 = vmax.f32 %v1583_v53, 0.0  ;;  %v1357_v56 = vpack.c.bf16 %v449_v54, %v448_v52  ;;  %v1363_v53 = vpack.c.bf16 %v532_v61, %v531_v59  ;;  %v718_v52 = vld [vmem:[%s1751_s11 + $0x8] sm:$0xff]  ;;  %v719_v61 = vld [vmem:[%s1751_s11 + $0x10] sm:$0xff] }
  0xf1   :  { %1061 = vmatmul.mubr.f32.vlgmr.msra.gmra.mrb[0].mxu1 %v148_v55 }
  0xf2   :  { %1130 = vmatprep.mubr.msk.f32.mxu1 %vm1453_vm0, %v1454_v1  ;;  %1313 = vmatpush3.bf16.msra.mxu1 %v1312_v62  ;;  %v534_v62 = vld [vmem:[#allocation2 + $0x228] sm:$0xff] }
  0xf3   :  { %1314 = vmatprep.subr.bf16.mxu1 %v1452_v0 }
  0xf6   :  { %1316 = vmatpush3.bf16.msra.mxu1 %v1315_v2  ;;  %v535_v2 = vld [vmem:[#allocation2 + $0x230] sm:$0xff] }
  0xf7   :  { %1317 = vmatprep.subr.bf16.mxu1 %v1452_v0  ;;  %v1369_v4 = vpack.c.bf16 %v536_v3, %v535_v2 }
  0xfa   :  { %1319 = vmatpush3.bf16.msra.mxu1 %v1318_v5  ;;  %v537_v5 = vld [vmem:[#allocation2 + $0x240] sm:$0xff] }
  0xfb   :  { %1320 = vmatprep.subr.bf16.mxu1 %v1452_v0  ;;  %v1372_v7 = vpack.c.bf16 %v538_v6, %v537_v5 }
  0xfe   :  { %1322 = vmatpush3.bf16.msra.mxu1 %v1321_v8  ;;  %v539_v8 = vld [vmem:[#allocation2 + $0x250] sm:$0xff] }
  0xff   :  { %1323 = vmatprep.subr.bf16.mxu1 %v1452_v0  ;;  %v1375_v10 = vpack.c.bf16 %v540_v9, %v539_v8  ;;  %v806_v8 = vld [vmem:[%s1753_s13 + $0x18] sm:$0xff] }
 0x102   :  { %1325 = vmatpush3.bf16.msra.mxu1 %v1324_v11  ;;  %v541_v11 = vld [vmem:[#allocation2 + $0x260] sm:$0xff] }
 0x103   :  { %1326 = vmatprep.subr.bf16.mxu1 %v1452_v0  ;;  %v1378_v13 = vpack.c.bf16 %v542_v12, %v541_v11 }
 0x106   :  { %1328 = vmatpush3.bf16.msra.mxu1 %v1327_v14  ;;  %v898_v14 = vld [vmem:[%s1746_s6] ss:$0 sm:$0xff] }
 0x107   :  { %1329 = vmatprep.subr.bf16.mxu1 %v1452_v0 }
 0x10a   :  { %1331 = vmatpush3.bf16.msra.mxu1 %v1330_v17 }
 0x10b   :  { %1332 = vmatprep.subr.bf16.mxu1 %v1452_v0 }
 0x10e   :  { %1334 = vmatpush3.bf16.msra.mxu1 %v1333_v25 }
 0x10f   :  { %1359 = vmatprep.subr.bf16.mxu1 %v1452_v0 }
 0x1c4   :  { %v238_v19 = vpop.f32.mrb[0].mxu1 }
 0x1c5   :  { %v239_v20 = vadd.f32 %v896_v18, %v238_v19  ;;  %v1062_v21 = vpop.f32.mrb[1].mxu1  ;;  %v543_v19 = vld [vmem:[#allocation2 + $0x270] sm:$0xff] }
 0x1c7   :  { %v242_v22 = vmax.f32 %v239_v20, 0.0  ;;  %v544_v20 = vld [vmem:[#allocation2 + $0x278] sm:$0xff] }
 0x1c8   :  { %v1381_v21 = vpack.c.bf16 %v544_v20, %v543_v19 }
 0x1c9   :  { %1096 = vmatmul.mubr.f32.vlgmr.msra.gmra.mrb[2].mxu0 %v242_v22  ;;  %v623_v22 = vld [vmem:[%s1749_s9] sm:$0xff] }
 0x1ca   :  { %1165 = vmatprep.mubr.msk.f32.mxu0 %vm1453_vm0, %v1454_v1  ;;  %1337 = vmatpush3.bf16.msra.mxu0 %v1336_v29  ;;  %v1384_v25 = vpack.c.bf16 %v624_v23, %v623_v22  ;;  %v628_v29 = vld [vmem:[%s1749_s9 + $0x28] sm:$0xff] }
 0x1cb   :  { %1338 = vmatprep.subr.bf16.mxu0 %v1452_v0  ;;  %v1390_v30 = vpack.c.bf16 %v628_v29, %v627_v28 }
 0x1ce   :  { %1340 = vmatpush3.bf16.msra.mxu0 %v1339_v31  ;;  %v629_v31 = vld [vmem:[%s1749_s9 + $0x30] sm:$0xff] }
 0x1cf   :  { %1341 = vmatprep.subr.bf16.mxu0 %v1452_v0  ;;  %v1393_v33 = vpack.c.bf16 %v630_v32, %v629_v31 }
 0x1d2   :  { %1343 = vmatpush3.bf16.msra.mxu0 %v1342_v34  ;;  %v631_v34 = vld [vmem:[%s1749_s9 + $0x40] sm:$0xff] }
 0x1d3   :  { %1344 = vmatprep.subr.bf16.mxu0 %v1452_v0  ;;  %v1396_v36 = vpack.c.bf16 %v632_v35, %v631_v34 }
 0x1d6   :  { %1346 = vmatpush3.bf16.msra.mxu0 %v1345_v37  ;;  %v633_v37 = vld [vmem:[%s1749_s9 + $0x50] sm:$0xff] }
 0x1d7   :  { %1347 = vmatprep.subr.bf16.mxu0 %v1452_v0  ;;  %v1399_v39 = vpack.c.bf16 %v634_v38, %v633_v37 }
 0x1da   :  { %1349 = vmatpush3.bf16.msra.mxu0 %v1348_v40  ;;  %v635_v40 = vld [vmem:[%s1749_s9 + $0x60] sm:$0xff] }
 0x1db   :  { %1350 = vmatprep.subr.bf16.mxu0 %v1452_v0  ;;  %v1402_v42 = vpack.c.bf16 %v636_v41, %v635_v40 }
 0x1de   :  { %1352 = vmatpush3.bf16.msra.mxu0 %v1351_v43  ;;  %v899_v43 = vld [vmem:[%s1747_s7] ss:$0 sm:$0xff] }
 0x1df   :  { %1353 = vmatprep.subr.bf16.mxu0 %v1452_v0 }
 0x1e2   :  { %1355 = vmatpush3.bf16.msra.mxu0 %v1354_v46 }
 0x1e3   :  { %1356 = vmatprep.subr.bf16.mxu0 %v1452_v0 }
 0x1e6   :  { %1358 = vmatpush3.bf16.msra.mxu0 %v1357_v56  ;;  %v900_v56 = vld [vmem:[%s1748_s8] ss:$0 sm:$0xff] }
 0x1e7   :  { %1383 = vmatprep.subr.bf16.mxu0 %v1452_v0 }
 0x29c   :  { %v333_v48 = vpop.f32.mrb[2].mxu0 }
 0x29d   :  { %v334_v49 = vadd.f32 %v897_v47, %v333_v48  ;;  %v1097_v50 = vpop.f32.mrb[3].mxu0  ;;  %v637_v48 = vld [vmem:[%s1749_s9 + $0x70] sm:$0xff] }
 0x29f   :  { %v1616_v51 = vadd.f32 %v334_v49, %v148_v55  ;;  %v533_v55 = vld [vmem:[#allocation2 + $0x220] sm:$0xff]  ;;  %v638_v49 = vld [vmem:[%s1749_s9 + $0x78] sm:$0xff] }
 0x2a0   :  { %v1366_v63 = vpack.c.bf16 %v534_v62, %v533_v55  ;;  %v1405_v50 = vpack.c.bf16 %v638_v49, %v637_v48  ;;  %v803_v62 = vld [vmem:[%s1753_s13] sm:$0xff] }
 0x2a1   :  { %1131 = vmatmul.mubr.f32.vlgmr.msra.gmra.mrb[2].mxu1 %v1616_v51 }
 0x2a2   :  { %1200 = vmatprep.mubr.msk.f32.mxu1 %vm1453_vm0, %v1454_v1  ;;  %1361 = vmatpush3.bf16.msra.mxu1 %v1360_v60 }
 0x2a3   :  { %1362 = vmatprep.subr.bf16.mxu1 %v1452_v0 }
 0x2a6   :  { %1364 = vmatpush3.bf16.msra.mxu1 %v1363_v53  ;;  %v720_v53 = vld [vmem:[%s1751_s11 + $0x18] sm:$0xff] }
 0x2a7   :  { %1365 = vmatprep.subr.bf16.mxu1 %v1452_v0  ;;  %v1411_v55 = vpack.c.bf16 %v720_v53, %v719_v61 }
 0x2aa   :  { %1367 = vmatpush3.bf16.msra.mxu1 %v1366_v63  ;;  %v804_v63 = vld [vmem:[%s1753_s13 + $0x8] sm:$0xff] }
 0x2ab   :  { %1368 = vmatprep.subr.bf16.mxu1 %v1452_v0  ;;  %v1414_v2 = vpack.c.bf16 %v804_v63, %v803_v62 }
 0x2ae   :  { %1370 = vmatpush3.bf16.msra.mxu1 %v1369_v4 }
 0x2af   :  { %1371 = vmatprep.subr.bf16.mxu1 %v1452_v0 }
 0x2b2   :  { %1373 = vmatpush3.bf16.msra.mxu1 %v1372_v7  ;;  %v805_v7 = vld [vmem:[%s1753_s13 + $0x10] sm:$0xff] }
 0x2b3   :  { %1374 = vmatprep.subr.bf16.mxu1 %v1452_v0  ;;  %v1417_v9 = vpack.c.bf16 %v806_v8, %v805_v7 }
 0x2b6   :  { %1376 = vmatpush3.bf16.msra.mxu1 %v1375_v10 }
 0x2b7   :  { %1377 = vmatprep.subr.bf16.mxu1 %v1452_v0 }
 0x2ba   :  { %1379 = vmatpush3.bf16.msra.mxu1 %v1378_v13 }
 0x2bb   :  { %1380 = vmatprep.subr.bf16.mxu1 %v1452_v0 }
 0x2be   :  { %1382 = vmatpush3.bf16.msra.mxu1 %v1381_v21 }
 0x2bf   :  { %1407 = vmatprep.subr.bf16.mxu1 %v1452_v0 }
 0x374   :  { %v428_v15 = vpop.f32.mrb[2].mxu1 }
 0x375   :  { %v429_v16 = vadd.f32 %v898_v14, %v428_v15  ;;  %v1132_v17 = vpop.f32.mrb[3].mxu1  ;;  %v904_v14 = vld [vmem:[%s1754_s14] ss:$0 sm:$0xff] }
 0x377   :  { %v432_v18 = vmax.f32 %v429_v16, 0.0 }
 0x379   :  { %1166 = vmatmul.mubr.f32.vlgmr.msra.gmra.mrb[4].mxu0 %v432_v18 }
 0x37a   :  { %1235 = vmatprep.mubr.msk.f32.mxu0 %vm1453_vm0, %v1454_v1  ;;  %1385 = vmatpush3.bf16.msra.mxu0 %v1384_v25 }
 0x37b   :  { %1386 = vmatprep.subr.bf16.mxu0 %v1452_v0 }
 0x37e   :  { %1388 = vmatpush3.bf16.msra.mxu0 %v1387_v27 }
 0x37f   :  { %1389 = vmatprep.subr.bf16.mxu0 %v1452_v0 }
 0x382   :  { %1391 = vmatpush3.bf16.msra.mxu0 %v1390_v30 }
 0x383   :  { %1392 = vmatprep.subr.bf16.mxu0 %v1452_v0 }
 0x386   :  { %1394 = vmatpush3.bf16.msra.mxu0 %v1393_v33 }
 0x387   :  { %1395 = vmatprep.subr.bf16.mxu0 %v1452_v0 }
 0x38a   :  { %1397 = vmatpush3.bf16.msra.mxu0 %v1396_v36 }
 0x38b   :  { %1398 = vmatprep.subr.bf16.mxu0 %v1452_v0 }
 0x38e   :  { %1400 = vmatpush3.bf16.msra.mxu0 %v1399_v39 }
 0x38f   :  { %1401 = vmatprep.subr.bf16.mxu0 %v1452_v0 }
 0x392   :  { %1403 = vmatpush3.bf16.msra.mxu0 %v1402_v42 }
 0x393   :  { %1404 = vmatprep.subr.bf16.mxu0 %v1452_v0 }
 0x396   :  { %1406 = vmatpush3.bf16.msra.mxu0 %v1405_v50 }
 0x397   :  { %1413 = vmatprep.subr.bf16.mxu0 %v1452_v0 }
 0x44c   :  { %v523_v44 = vpop.f32.mrb[4].mxu0 }
 0x44d   :  { %v524_v45 = vadd.f32 %v899_v43, %v523_v44  ;;  %v1167_v46 = vpop.f32.mrb[5].mxu0 }
 0x44f   :  { %v527_v47 = vadd.f32 %v524_v45, %v1616_v51  ;;  %v717_v51 = vld [vmem:[%s1751_s11] sm:$0xff] }
 0x450   :  { %v1408_v54 = vpack.c.bf16 %v718_v52, %v717_v51 }
 0x451   :  { %1201 = vmatmul.mubr.f32.vlgmr.msra.gmra.mrb[4].mxu1 %v527_v47 }
 0x452   :  { %1246 = vmatprep.mubr.msk.f32.mxu1 %vm1453_vm0, %v1454_v1  ;;  %1409 = vmatpush3.bf16.msra.mxu1 %v1408_v54 }
 0x453   :  { %1410 = vmatprep.subr.bf16.mxu1 %v1452_v0 }
 0x456   :  { %1412 = vmatpush3.bf16.msra.mxu1 %v1411_v55 }
 0x524   :  { %v618_v57 = vpop.f32.mrb[4].mxu1 }
 0x525   :  { %v619_v58 = vadd.f32 %v900_v56, %v618_v57  ;;  %v1202_v59 = vpop.f32.mrb[5].mxu1 }
 0x527   :  { %v622_v60 = vmax.f32 %v619_v58, 0.0 }
 0x529   :  { %1236 = vmatmul.mubr.f32.vlgmr.msra.gmra.mrb[6].mxu0 %v622_v60 }
 0x52a   :  { %1257 = vmatprep.mubr.msk.f32.mxu0 %vm1453_vm0, %v1454_v1  ;;  %1415 = vmatpush3.bf16.msra.mxu0 %v1414_v2  ;;  %v901_v1 = vld [vmem:[%s1750_s10] ss:$0 sm:$0xff] }
 0x52b   :  { %1416 = vmatprep.subr.bf16.mxu0 %v1452_v0  ;;  %v902_v0 = vld [vmem:[%s1752_s12] ss:$0 sm:$0xff] }
 0x52e   :  { %1418 = vmatpush3.bf16.msra.mxu0 %v1417_v9 }
 0x5fc   :  { %v712_v3 = vpop.f32.mrb[6].mxu0 }
 0x5fd   :  { %v713_v4 = vadd.f32 %v901_v1, %v712_v3  ;;  %v1237_v5 = vpop.f32.mrb[7].mxu0 }
 0x5ff   :  { %v716_v6 = vmax.f32 %v713_v4, 0.0 }
 0x601   :  { %1247 = vmatmul.mubr.msk.f32.vlgmr.msra.gmra.mrb[6].mxu1 %vm728_vm2, %v716_v6 }
 0x6d4   :  { %v798_v10 = vpop.f32.mrb[6].mxu1 }
 0x6d5   :  { %v799_v11 = vadd.f32 %v902_v0, %v798_v10  ;;  %v1248_v12 = vpop.f32.mrb[7].mxu1 }
 0x6d7   :  { %v802_v13 = vmax.f32 %v799_v11, 0.0 }
 0x6d9   :  { %1258 = vmatmul.mubr.msk.f32.vlgmr.msra.gmra.mrb[8].mxu0 %vm728_vm2, %v802_v13 }
 0x7ac   :  { %v883_v15 = vpop.f32.mrb[8].mxu0 }
 0x7ad   :  { %v884_v16 = vadd.f32 %v904_v14, %v883_v15  ;;  %v1259_v17 = vpop.f32.mrb[9].mxu0 }
 0x7af   :  { %v887_v18 = vmax.f32 %v884_v16, 0.0 }
 0x7b1   :  { %888 = vst [vmem:[%s1755_s15] sm:$0xff] %v887_v18 }
 0x7b2   :  { %893 = vsyncpa [#allocation3], 1 }

</bundles_post_ra>
